<compile_context>
chip_gen: v5e
topology: v5e:2x2
jax: 0.10.0
libtpu: 0.0.40
codegen_flags: <defaults>
</compile_context>

<pallas_src>
import functools
import math

import jax
import jax.numpy as jnp
from jax import lax
from jax.experimental import pallas as pl
from jax.experimental.pallas import tpu as pltpu


def _cdiv(a, b):
    return -(-a // b)


def _round_up(x, m):
    return _cdiv(x, m) * m


_MAX_TILE_BYTES = 4 * 1024 * 1024      # per input, per pipeline buffer (2 in x 2 buf = 16 MiB)
_VMEM_LIMIT_BYTES = 32 * 1024 * 1024   # safe on v5e/v6e (128 MiB phys) and v7x (64 MiB phys)
_CHUNK_ROWS = 512                      # rows per in-tile reduction chunk (caps f32 scratch)
_FAST_PATH_BYTES = 4 * 1024 * 1024     # below this (x+y combined) a fused XLA reduce wins


def _accum_tile(x_ref, y_ref, o_ref, *, rows, chunk_rows, valid_rows=None):
    """Accumulate sum((x - y)^2) over rows [0, rows) of the current tile into o_ref.

    `rows`, `chunk_rows`, `valid_rows` are static.  If `valid_rows` is not None, rows
    in [valid_rows, rows) are zeroed with a select, so NaN/Inf garbage from the
    partial-tile DMA can never reach the sum.
    """

    def chunk(r0, nr, limit):
        x = x_ref[0, pl.ds(r0, nr), :]
        y = y_ref[0, pl.ds(r0, nr), :]
        # Subtract in the native input dtype (bf16 VALU on v6e/v7x; matches torch's
        # `inputs - outputs`), widen once, square/accumulate in f32.
        d = (x - y).astype(jnp.float32)
        sq = d * d
        if limit is not None:
            rid = lax.broadcasted_iota(jnp.int32, sq.shape, 0) + r0
            sq = jnp.where(rid < limit, sq, 0.0)          # select, not multiply-by-mask
        # (nr,128) -> (nr//8, 8, 128) is a tile-aligned regroup; the sum is pure VALU.
        return sq.reshape(nr // 8, 8, 128).sum(axis=0)

    acc = jnp.zeros((8, 128), jnp.float32)
    n_full = rows // chunk_rows
    rem = rows - n_full * chunk_rows
    # Only the trailing chunk can straddle `valid_rows`; all earlier chunks are
    # provably fully valid, so they never pay the mask.
    mask_last_full = (valid_rows is not None) and rem == 0
    n_loop = n_full - 1 if mask_last_full else n_full
    if n_loop > 0:
        def body(c, a):
            r0 = pl.multiple_of(c * chunk_rows, chunk_rows)
            return a + chunk(r0, chunk_rows, None)
        acc = lax.fori_loop(0, n_loop, body, acc)
    if mask_last_full:
        acc = acc + chunk(n_loop * chunk_rows, chunk_rows, valid_rows)
    elif rem > 0:
        acc = acc + chunk(n_full * chunk_rows, rem, valid_rows)
    o_ref[...] += acc[None, None]


def _dcc_sq_kernel(x_ref, y_ref, o_ref, *, tile_rows, chunk_rows,
                   last_tile_rows, last_tile_valid, tiles_per_split, num_splits):
    t = pl.program_id(2)

    @pl.when(t == 0)
    def _():
        o_ref[...] = jnp.zeros_like(o_ref)

    if last_tile_rows == tile_rows and last_tile_valid is None:
        # Every tile is full: a single mask-free path for the whole grid.
        _accum_tile(x_ref, y_ref, o_ref, rows=tile_rows, chunk_rows=chunk_rows)
    else:
        # Only the globally-last tile is partial; gate the short/masked path behind
        # pl.when so full tiles never see iota/compare/select.
        if num_splits == 1:
            is_last = t == tiles_per_split - 1
        else:
            is_last = jnp.logical_and(t == tiles_per_split - 1,
                                      pl.program_id(1) == num_splits - 1)

        @pl.when(jnp.logical_not(is_last))
        def _():
            _accum_tile(x_ref, y_ref, o_ref, rows=tile_rows, chunk_rows=chunk_rows)

        @pl.when(is_last)
        def _():
            _accum_tile(x_ref, y_ref, o_ref, rows=last_tile_rows,
                        chunk_rows=chunk_rows, valid_rows=last_tile_valid)


def _fused_reference(inputs, outputs, weights, size_average):
    """Fused XLA path for ragged/tiny shapes; also the test reference."""
    N = inputs.shape[0]
    d = (inputs - outputs).reshape(N, -1).astype(jnp.float32)   # subtract in input dtype (torch)
    sq = jnp.sum(d * d, axis=1)                                  # ||.||_2 ** 2
    out = jnp.sum(weights.reshape(-1).astype(jnp.float32) * sq)
    if size_average:
        out = out / inputs.size
    return out


@functools.partial(jax.jit, static_argnames=("size_average", "force_kernel"))
def dcc_weighted_e_loss(inputs, outputs, weights, size_average=True, force_kernel=False):
    N = inputs.shape[0]
    D = int(math.prod(inputs.shape[1:])) if inputs.ndim > 1 else 1
    nelement = inputs.size                                # static shape product

    stream_bytes = inputs.size * inputs.dtype.itemsize + outputs.size * outputs.dtype.itemsize
    lane_aligned = (D % 128 == 0) and (D >= 1024)
    if not lane_aligned or (stream_bytes < _FAST_PATH_BYTES and not force_kernel):
        # Ragged-D or tiny problems: a single fused XLA reduction is at the HBM
        # roofline, avoids any padded copy of x/y, and skips the pallas_call fixed cost.
        return _fused_reference(inputs, outputs, weights, size_average)

    R = D // 128
    x = inputs.reshape(N, R, 128)                         # free row-major bitcast, native dtype
    y = outputs.reshape(N, R, 128)

    itemsize = max(x.dtype.itemsize, y.dtype.itemsize)
    tr_max = max(8, (_MAX_TILE_BYTES // (128 * itemsize)) // 8 * 8)
    tr_cap = min(tr_max, (R // 8) * 8)                    # sublane-aligned, never exceeds R
    nb = _cdiv(R, tr_cap)                                 # target row blocks per sample
    TR = min(_round_up(_cdiv(R, nb), 8), tr_cap)          # balanced tile rows (no near-empty tail)
    RB = _cdiv(R, TR)                                     # actual row blocks per sample

    # Per-sample row split: only when N alone can't feed both TensorCores of a 2-TC
    # chip (v7x), and only with even RB so no overhang tile is ever DMA'd and discarded.
    S = 2 if (N == 1 and RB >= 2 and RB % 2 == 0) else 1
    TPS = RB // S                                         # S * TPS == RB exactly

    valid_last = R - (RB - 1) * TR                        # real rows in the last tile
    if valid_last == TR:
        last_rows, last_valid = TR, None                  # no partial tile at all
    else:
        last_rows = _round_up(valid_last, 8)              # buffer rows actually touched
        last_valid = None if valid_last % 8 == 0 else valid_last
    chunk_rows = min(_CHUNK_ROWS, TR)

    kernel = functools.partial(
        _dcc_sq_kernel,
        tile_rows=TR, chunk_rows=chunk_rows,
        last_tile_rows=last_rows, last_tile_valid=last_valid,
        tiles_per_split=TPS, num_splits=S)

    def xy_map(n, s, t):
        return (n, s * TPS + t, 0)

    out_bytes = N * S * 8 * 128 * 4
    partials = pl.pallas_call(
        kernel,
        out_shape=jax.ShapeDtypeStruct((N, S, 8, 128), jnp.float32),
        grid=(N, S, TPS),
        in_specs=[
            pl.BlockSpec((1, TR, 128), xy_map),           # inputs tile
            pl.BlockSpec((1, TR, 128), xy_map),           # outputs tile
        ],
        out_specs=pl.BlockSpec((1, 1, 8, 128), lambda n, s, t: (n, s, 0, 0)),
        compiler_params=pltpu.CompilerParams(
            dimension_semantics=("parallel", "parallel", "arbitrary"),
            vmem_limit_bytes=_VMEM_LIMIT_BYTES,
        ),
        cost_estimate=pl.CostEstimate(
            flops=3 * N * D,
            transcendentals=0,
            bytes_accessed=x.nbytes + y.nbytes + out_bytes,
        ),
    )(x, y)

    per_sample = jnp.sum(partials, axis=(1, 2, 3))        # ||x_i - y_i||_2^2
    loss = jnp.sum(weights.reshape(-1).astype(jnp.float32) * per_sample)
    if size_average:
        loss = loss / nelement
    return loss


def _check(name, got, want, rtol, atol):
    # mirrors the module's np.isfinite assert (host-side on the result)
    assert bool(jnp.isfinite(got)), f"{name}: Nan found in data"
    assert jnp.allclose(got, want, rtol=rtol, atol=atol), (name, got, want)


if __name__ == "__main__":
    keys = jax.random.split(jax.random.PRNGKey(0), 10)

    # 1) main check: NCHW f32 at the module's typical small shape (D = 4*16*16 = 1024)
    x = jax.random.normal(keys[0], (2, 4, 16, 16), dtype=jnp.float32)
    y = jax.random.normal(keys[1], (2, 4, 16, 16), dtype=jnp.float32)
    w = jax.random.uniform(keys[2], (2,), dtype=jnp.float32)
    got = jax.block_until_ready(
        dcc_weighted_e_loss(x, y, w, size_average=True, force_kernel=True))
    _check("f32 aligned", got, _fused_reference(x, y, w, True), 1e-5, 1e-7)

    # 2) multi-tile reduction + gated ragged-tile mask (D = 5*16*32 = 2560 -> R = 20)
    x2 = jax.random.normal(keys[3], (2, 5, 16, 32), dtype=jnp.float32)
    y2 = jax.random.normal(keys[4], (2, 5, 16, 32), dtype=jnp.float32)
    got = jax.block_until_ready(
        dcc_weighted_e_loss(x2, y2, w, size_average=True, force_kernel=True))
    _check("f32 ragged-R", got, _fused_reference(x2, y2, w, True), 1e-5, 1e-7)

    # 3) N == 1 -> parity-aware 2-way row split (S = 2), no overhang DMA
    x3 = jax.random.normal(keys[5], (1, 5, 16, 32), dtype=jnp.float32)
    y3 = jax.random.normal(keys[6], (1, 5, 16, 32), dtype=jnp.float32)
    w3 = jax.random.uniform(keys[7], (1,), dtype=jnp.float32)
    got = jax.block_until_ready(
        dcc_weighted_e_loss(x3, y3, w3, size_average=False, force_kernel=True))
    _check("f32 split", got, _fused_reference(x3, y3, w3, False), 1e-5, 1e-6)

    # 4) bf16 path: native-dtype subtract, f32 accumulate (D = 8*32*32 = 8192).
    #    Tolerance loosened slightly: the reference rounds the difference to bf16
    #    (as torch would); the kernel may keep it wider on some generations.
    xb = jax.random.normal(keys[8], (2, 8, 32, 32), dtype=jnp.bfloat16)
    yb = jax.random.normal(keys[9], (2, 8, 32, 32), dtype=jnp.bfloat16)
    got = jax.block_until_ready(
        dcc_weighted_e_loss(xb, yb, w, size_average=False, force_kernel=True))
    _check("bf16 aligned", got, _fused_reference(xb, yb, w, False), 5e-3, 1e-2)

    # 5) ragged-D / tiny shapes take the fused XLA path (no padded HBM copy)
    xr = jax.random.normal(keys[0], (2, 3, 20, 20), dtype=jnp.float32)
    yr = jax.random.normal(keys[1], (2, 3, 20, 20), dtype=jnp.float32)
    got = jax.block_until_ready(dcc_weighted_e_loss(xr, yr, w, size_average=False))
    _check("ragged-D fallback", got, _fused_reference(xr, yr, w, False), 1e-5, 1e-6)

    print("KERNEL_OK")
</pallas_src>

<mosaic_0001>
module attributes {stable_mosaic.version = 11 : i64} {
  func.func @_dcc_sq_kernel(%arg0: i32, %arg1: i32, %arg2: i32, %arg3: memref<1x8x128xf32, #tpu.memory_space<vmem>>, %arg4: memref<1x8x128xf32, #tpu.memory_space<vmem>>, %arg5: memref<1x1x8x128xf32, #tpu.memory_space<vmem>>) attributes {dimension_semantics = [#tpu.dimension_semantics<parallel>, #tpu.dimension_semantics<parallel>, #tpu.dimension_semantics<arbitrary>], iteration_bounds = array<i64: 2, 1, 1>, scalar_prefetch = 0 : i64, scratch_operands = 0 : i64, tpu.core_type = #tpu.core_type<tc>, window_params = [{transform_indices = @transform_0, window_bounds = array<i64: 1, 8, 128>}, {transform_indices = @transform_1, window_bounds = array<i64: 1, 8, 128>}, {transform_indices = @transform_2, window_bounds = array<i64: 1, 1, 8, 128>}]} {
    %c0_i32 = arith.constant 0 : i32
    %0 = arith.cmpi eq, %arg2, %c0_i32 : i32
    %1 = arith.extui %0 : i1 to i32
    %c0_i32_0 = arith.constant 0 : i32
    %2 = arith.cmpi ne, %1, %c0_i32_0 : i32
    scf.if %2 {
      %cst_14 = arith.constant 0.000000e+00 : f32
      %21 = vector.broadcast %cst_14 : f32 to vector<1x1x8x128xf32>
      %c0_15 = arith.constant 0 : index
      %c0_16 = arith.constant 0 : index
      %c0_17 = arith.constant 0 : index
      %c0_18 = arith.constant 0 : index
      %22 = vector.load %arg5[%c0_15, %c0_16, %c0_17, %c0_18] : memref<1x1x8x128xf32, #tpu.memory_space<vmem>>, vector<1x1x8x128xf32>
      tpu.vector_store %arg5[%c0_15, %c0_16, %c0_17, %c0_18], %21 {strides = array<i32>} : memref<1x1x8x128xf32, #tpu.memory_space<vmem>>, vector<1x1x8x128xf32>,
    } else {
    }
    %cst = arith.constant 0.000000e+00 : f32
    %3 = vector.broadcast %cst : f32 to vector<8x128xf32>
    %c0_i32_1 = arith.constant 0 : i32
    %c8_i32 = arith.constant 8 : i32
    %4 = arith.muli %c0_i32_1, %c8_i32 : i32
    %5 = tpu.assume_multiple %4, 8 : i32
    %c0 = arith.constant 0 : index
    %6 = arith.index_cast %5 : i32 to index
    %c0_2 = arith.constant 0 : index
    %7 = vector.load %arg3[%c0, %6, %c0_2] : memref<1x8x128xf32, #tpu.memory_space<vmem>>, vector<1x8x128xf32>
    %8 = vector.shape_cast %7 : vector<1x8x128xf32> to vector<8x128xf32>
    %c0_3 = arith.constant 0 : index
    %9 = arith.index_cast %5 : i32 to index
    %c0_4 = arith.constant 0 : index
    %10 = vector.load %arg4[%c0_3, %9, %c0_4] : memref<1x8x128xf32, #tpu.memory_space<vmem>>, vector<1x8x128xf32>
    %11 = vector.shape_cast %10 : vector<1x8x128xf32> to vector<8x128xf32>
    %12 = arith.subf %8, %11 : vector<8x128xf32>
    %13 = arith.mulf %12, %12 : vector<8x128xf32>
    %14 = vector.shape_cast %13 : vector<8x128xf32> to vector<1x8x128xf32>
    %cst_5 = arith.constant dense<0.000000e+00> : vector<8x128xf32>
    %15 = vector.multi_reduction <add>, %14, %cst_5 [0] : vector<1x8x128xf32> to vector<8x128xf32>
    %16 = arith.addf %3, %15 : vector<8x128xf32>
    %c1_i32 = arith.constant 1 : i32
    %c0_6 = arith.constant 0 : index
    %c0_7 = arith.constant 0 : index
    %c0_8 = arith.constant 0 : index
    %c0_9 = arith.constant 0 : index
    %17 = vector.load %arg5[%c0_6, %c0_7, %c0_8, %c0_9] : memref<1x1x8x128xf32, #tpu.memory_space<vmem>>, vector<1x1x8x128xf32>
    %18 = vector.shape_cast %16 : vector<8x128xf32> to vector<1x1x8x128xf32>
    %19 = arith.addf %17, %18 : vector<1x1x8x128xf32>
    %c0_10 = arith.constant 0 : index
    %c0_11 = arith.constant 0 : index
    %c0_12 = arith.constant 0 : index
    %c0_13 = arith.constant 0 : index
    %20 = vector.load %arg5[%c0_10, %c0_11, %c0_12, %c0_13] : memref<1x1x8x128xf32, #tpu.memory_space<vmem>>, vector<1x1x8x128xf32>
    tpu.vector_store %arg5[%c0_10, %c0_11, %c0_12, %c0_13], %19 {strides = array<i32>} : memref<1x1x8x128xf32, #tpu.memory_space<vmem>>, vector<1x1x8x128xf32>,
    return
  }
  func.func @transform_0(%arg0: i32, %arg1: i32, %arg2: i32) -> (i32, i32, i32) {
    %c1_i32 = arith.constant 1 : i32
    %0 = arith.muli %arg1, %c1_i32 : i32
    %1 = arith.addi %0, %arg2 : i32
    %c0_i32 = arith.constant 0 : i32
    %c0_i32_0 = arith.constant 0 : i32
    return %arg0, %1, %c0_i32 : i32, i32, i32
  }
  func.func @transform_1(%arg0: i32, %arg1: i32, %arg2: i32) -> (i32, i32, i32) {
    %c1_i32 = arith.constant 1 : i32
    %0 = arith.muli %arg1, %c1_i32 : i32
    %1 = arith.addi %0, %arg2 : i32
    %c0_i32 = arith.constant 0 : i32
    %c0_i32_0 = arith.constant 0 : i32
    return %arg0, %1, %c0_i32 : i32, i32, i32
  }
  func.func @transform_2(%arg0: i32, %arg1: i32, %arg2: i32) -> (i32, i32, i32, i32) {
    %c0_i32 = arith.constant 0 : i32
    %c0_i32_0 = arith.constant 0 : i32
    %c0_i32_1 = arith.constant 0 : i32
    return %arg0, %arg1, %c0_i32, %c0_i32_0 : i32, i32, i32, i32
  }
}

</mosaic_0001>

<bundles_post_ra>
// kernel: dcc_weighted_e_loss.1
= control target key start
LH: loop header
LB: loop body
LE: loop exit
PB: predicated region body
PF: predicated region fallthrough
CT: control target
= control target key end

     0   :  { %s399_s9 = smov 0   ;;  %s401_s10 = smov 0   ;;  %s423_s0 = inlined_call_operand.vmem [shape: f32[2,8,128], index: 0, kind: input, shape index: {}]   ;;  %s424_s1 = inlined_call_operand.vmem [shape: f32[2,8,128], index: 1, kind: input, shape index: {}]   ;;  %s425_s2 = inlined_call_operand.vmem [shape: f32[2,1,8,128], index: 2, kind: output, shape index: {}]  }
   0x1   :  { %s403_s11 = smov 0  }
   0x2 LB: > { %s31_s12 = sadd.s32 1, %s378_s10  ;;  %p329_p0 = scmp.ge.s32.totalorder %s382_s11, 1  ;;  %s382_s11 = sphi %s403_s11, %s12_s11   ;;  %s378_s10 = sphi %s401_s10, %s427_s10   ;;  %s374_s9 = sphi %s399_s9, %s426_s9  }
   0x3   : > { %p33_p1 = scmp.ge.s32.totalorder %s31_s12, 2  ;;  %p159_p2 = scmp.lt.s32.totalorder %s382_s11, 3 }
   0x5   : > { %s429_s12 = smov (%p33_p1, %s31_s12), 0  ;;  %p160_p3 = pnand %p329_p0, %p159_p2 }
   0x6   : > { %p195_p4 = scmp.lt.s32.totalorder (!%p160_p3), %s374_s9, 1 }
   0x7   : > { %163 = sbr.rel (%p160_p3) target bundleno = 22 (0x16), region = 28 }
   0xc   : > { %s431_s9 = smov (!%p195_p4, %s374_s9), 1 }
   0xd   : > { %s330_s13 = sshll.u32 %s431_s9, 3 }
   0xe   : > { %s201_s16 = scalar_lea.vmem %s423_s0, %s330_s13  ;;  %s210_s19 = scalar_lea.vmem %s424_s1, %s330_s13 }
   0xf   : > { %v224_v0 = vld [vmem:[%s201_s16] sm:$0xff]  ;;  %s218_s22 = scalar_lea.vmem %s425_s2, %s330_s13 }
  0x10   : > { %v225_v1 = vld [vmem:[%s210_s19] sm:$0xff] }
  0x11   : > { %v226_v2 = vsub.f32 %v224_v0, %v225_v1 }
  0x13   : > { %v227_v3 = vmul.f32 %v226_v2, %v226_v2 }
  0x15   : > { %232 = vst [vmem:[%s218_s22] sm:$0xff] %v227_v3 }
  0x16 PF: > { %s12_s11 = sadd.s32 1, %s382_s11   ;;  %s426_s9 = smov %s378_s10 }
  0x17   : > { %p9_p5 = scmp.ge.s32.totalorder %s12_s11, 4   ;;  %s427_s10 = smov %s429_s12 }
  0x19   :  { %11 = sbr.rel (!%p9_p5) target bundleno = 2 (0x2), region = 65 }

</bundles_post_ra>
